<compile_context>
chip_gen: v7x
topology: tpu7x:2x2x1
jax: 0.10.0
libtpu: 0.0.40
codegen_flags: <defaults>
</compile_context>

<pallas_src>
import jax
import jax.numpy as jnp
from jax.experimental import pallas as pl
from jax.experimental.pallas import tpu as pltpu


def classifier_head_kernel(x_ref, wf_ref, bf_ref, o_ref):
    # Single fused affine map: [TB, F] @ [F, O] + [1, O], f32 accumulation on MXU.
    y = jnp.dot(x_ref[...], wf_ref[...], preferred_element_type=jnp.float32)
    y = y + bf_ref[...]
    o_ref[...] = y.astype(o_ref.dtype)


def _round_up(v, m):
    return (v + m - 1) // m * m


def classifier_head(x, w1, b1, w2, b2, *, block_b=1024):
    """x: [B, in]; w1: [in, in//2]; b1: [1, in//2]; w2: [in//2, out]; b2: [1, out]
    -> [B, out]  (eval-mode forward: dropout = identity)."""
    B, F = x.shape
    H = w1.shape[1]
    O = w2.shape[1]
    assert w1.shape[0] == F and w2.shape[0] == H
    assert b1.shape == (1, H) and b2.shape == (1, O)

    # ---- Fold the two Linears into one affine map (eval mode only). ----
    wf = jnp.dot(w1, w2, preferred_element_type=jnp.float32).astype(w1.dtype)
    bf = (jnp.dot(b1, w2, preferred_element_type=jnp.float32) + b2).astype(b2.dtype)
    # NOTE: callers wanting the bf16 MXU path can pass bf16 x / weights; f32
    # accumulation is kept inside the kernel via preferred_element_type.

    in_item = jnp.dtype(x.dtype).itemsize
    w_item = jnp.dtype(wf.dtype).itemsize
    sub = 16 if in_item == 2 else 8  # min sublane tile (bf16 packs 16 rows/vreg)

    # ---- Generation-aware VMEM budget and batch-tile size. ----
    try:
        vmem_cap = pltpu.get_tpu_info().vmem_capacity_bytes
    except Exception:
        vmem_cap = 64 << 20  # conservative fallback (v7x per-TC VMEM)
    budget = int(vmem_cap * 0.85)  # headroom for Mosaic internal scratch

    resident = 2 * (F * O + O) * w_item              # double-buffered constant blocks
    per_row = 2 * (F + O) * in_item + O * 4          # 2x-buffered x/out tiles + f32 acc
    tb_cap = max(sub, (budget - resident) // max(per_row, 1))
    TB = max(sub, min(block_b, tb_cap) // sub * sub)

    if B <= TB:
        TB = B  # single tile == full batch dim (always layout-legal)
    # Give megacore (v7x: 2 TCs) at least 2 grid steps when the batch allows;
    # one extra grid step (~0.35 us) is noise on single-TC chips.
    if B > 2 * sub and pl.cdiv(B, TB) == 1:
        TB = _round_up(pl.cdiv(B, 2), sub)
    grid = pl.cdiv(B, TB)

    footprint = resident + TB * per_row
    vmem_bytes = int(min(max(2 * footprint, 32 << 20), budget))

    cost = pl.CostEstimate(
        flops=2 * B * F * O,
        transcendentals=0,
        bytes_accessed=(B * F + B * O) * in_item + (F * O + O) * w_item,
    )

    out = pl.pallas_call(
        classifier_head_kernel,
        out_shape=jax.ShapeDtypeStruct((B, O), x.dtype),
        grid_spec=pltpu.PrefetchScalarGridSpec(
            num_scalar_prefetch=0,
            grid=(grid,),
            in_specs=[
                pl.BlockSpec((TB, F), lambda i: (i, 0)),  # x: tiled over batch
                pl.BlockSpec((F, O), lambda i: (0, 0)),   # fused weight: resident
                pl.BlockSpec((1, O), lambda i: (0, 0)),   # fused bias: resident
            ],
            out_specs=pl.BlockSpec((TB, O), lambda i: (i, 0)),
        ),
        compiler_params=pltpu.CompilerParams(
            dimension_semantics=("parallel",),  # megacore-shardable on v7x
            vmem_limit_bytes=vmem_bytes,
        ),
        cost_estimate=cost,
    )(x, wf, bf)

    return out


def init_params(key, in_features, out_features, dtype=jnp.float32):
    hidden = in_features // 2
    k1, k2, k3, k4 = jax.random.split(key, 4)
    # kaiming_normal_ (fan_in, leaky_relu a=0): std = sqrt(2 / fan_in)
    w1 = jax.random.normal(k1, (in_features, hidden), dtype) * jnp.sqrt(2.0 / in_features)
    w2 = jax.random.normal(k2, (hidden, out_features), dtype) * jnp.sqrt(2.0 / hidden)
    # PyTorch Linear default bias init: U(-1/sqrt(fan_in), 1/sqrt(fan_in))
    b1 = jax.random.uniform(k3, (1, hidden), dtype,
                            -1.0 / jnp.sqrt(in_features), 1.0 / jnp.sqrt(in_features))
    b2 = jax.random.uniform(k4, (1, out_features), dtype,
                            -1.0 / jnp.sqrt(hidden), 1.0 / jnp.sqrt(hidden))
    return w1, b1, w2, b2


if __name__ == "__main__":
    key = jax.random.PRNGKey(0)
    kx, kp = jax.random.split(key)

    B = 8
    in_features = 32
    out_features = 8

    x = jax.random.normal(kx, (B, in_features), jnp.float32)
    w1, b1, w2, b2 = init_params(kp, in_features, out_features)

    out = classifier_head(x, w1, b1, w2, b2)
    out = jax.block_until_ready(out)

    # Reference check in plain JAX (unfused; dropout is identity in eval mode).
    # Tolerance covers the f32 reassociation from folding W1@W2.
    ref = (x @ w1 + b1) @ w2 + b2
    assert out.shape == (B, out_features)
    assert jnp.allclose(out, ref, atol=1e-4, rtol=1e-4), "mismatch vs reference"

    print("KERNEL_OK")
</pallas_src>

<mosaic_0001>
module attributes {stable_mosaic.version = 11 : i64} {
  func.func @classifier_head_kernel(%arg0: i32, %arg1: memref<8x32xf32, #tpu.memory_space<vmem>>, %arg2: memref<32x8xf32, #tpu.memory_space<vmem>>, %arg3: memref<1x8xf32, #tpu.memory_space<vmem>>, %arg4: memref<8x8xf32, #tpu.memory_space<vmem>>) attributes {dimension_semantics = [#tpu.dimension_semantics<parallel>], iteration_bounds = array<i64: 1>, scalar_prefetch = 0 : i64, scratch_operands = 0 : i64, tpu.core_type = #tpu.core_type<tc>, window_params = [{transform_indices = @transform_0, window_bounds = array<i64: 8, 32>}, {pipeline_mode = #tpu.pipeline_mode<synchronous>, transform_indices = @transform_1, window_bounds = array<i64: 32, 8>}, {pipeline_mode = #tpu.pipeline_mode<synchronous>, transform_indices = @transform_2, window_bounds = array<i64: 1, 8>}, {transform_indices = @transform_3, window_bounds = array<i64: 8, 8>}]} {
    %c0 = arith.constant 0 : index
    %c0_0 = arith.constant 0 : index
    %0 = vector.load %arg1[%c0, %c0_0] : memref<8x32xf32, #tpu.memory_space<vmem>>, vector<8x32xf32>
    %c0_1 = arith.constant 0 : index
    %c0_2 = arith.constant 0 : index
    %1 = vector.load %arg2[%c0_1, %c0_2] : memref<32x8xf32, #tpu.memory_space<vmem>>, vector<32x8xf32>
    %cst = arith.constant dense<0.000000e+00> : vector<8x8xf32>
    %2 = tpu.matmul %0, %1, %cst {dimension_numbers = #tpu.dot_dimension_numbers<[1], [0], [0], [1], [0, 0, 1, 1], [], []>} : vector<8x32xf32>, vector<32x8xf32>, vector<8x8xf32> -> vector<8x8xf32>
    %c0_3 = arith.constant 0 : index
    %c0_4 = arith.constant 0 : index
    %3 = vector.load %arg3[%c0_3, %c0_4] : memref<1x8xf32, #tpu.memory_space<vmem>>, vector<1x8xf32>
    %4 = vector.broadcast %3 : vector<1x8xf32> to vector<8x8xf32>
    %5 = arith.addf %2, %4 : vector<8x8xf32>
    %c0_5 = arith.constant 0 : index
    %c0_6 = arith.constant 0 : index
    %6 = vector.load %arg4[%c0_5, %c0_6] : memref<8x8xf32, #tpu.memory_space<vmem>>, vector<8x8xf32>
    tpu.vector_store %arg4[%c0_5, %c0_6], %5 {strides = array<i32>} : memref<8x8xf32, #tpu.memory_space<vmem>>, vector<8x8xf32>,
    return
  }
  func.func @transform_0(%arg0: i32) -> (i32, i32) {
    %c0_i32 = arith.constant 0 : i32
    %c0_i32_0 = arith.constant 0 : i32
    return %arg0, %c0_i32 : i32, i32
  }
  func.func @transform_1(%arg0: i32) -> (i32, i32) {
    %c0_i32 = arith.constant 0 : i32
    %c0_i32_0 = arith.constant 0 : i32
    %c0_i32_1 = arith.constant 0 : i32
    return %c0_i32, %c0_i32_0 : i32, i32
  }
  func.func @transform_2(%arg0: i32) -> (i32, i32) {
    %c0_i32 = arith.constant 0 : i32
    %c0_i32_0 = arith.constant 0 : i32
    %c0_i32_1 = arith.constant 0 : i32
    return %c0_i32, %c0_i32_0 : i32, i32
  }
  func.func @transform_3(%arg0: i32) -> (i32, i32) {
    %c0_i32 = arith.constant 0 : i32
    %c0_i32_0 = arith.constant 0 : i32
    return %arg0, %c0_i32 : i32, i32
  }
}

</mosaic_0001>

<bundles_post_ra>
// kernel: tpu_custom_call.1
= control target key start
LH: loop header
LB: loop body
LE: loop exit
PB: predicated region body
PF: predicated region fallthrough
CT: control target
= control target key end

     0   :  { %v169_v3 = vmov 0.0|0.0   ;;  %vm170_vm0 = vmmov 0   ;;  %v171_v6 = vmov 0.0   ;;  %s223_s0 = inlined_call_operand.vmem [shape: f32[8,32], index: 0, kind: input, shape index: {}]   ;;  %s224_s1 = inlined_call_operand.vmem [shape: f32[32,8], index: 1, kind: input, shape index: {}]   ;;  %s225_s2 = inlined_call_operand.vmem [shape: f32[1,8], index: 2, kind: input, shape index: {}]   ;;  %s226_s3 = inlined_call_operand.hbm [shape: f32[8,8], index: 3, kind: output, shape index: {}]  }
   0x1   :  { %v16_v0 = vld [vmem:[%s224_s1] sm:$0xff]  ;;  %v17_v1 = vld [vmem:[%s224_s1 + $0x8] sm:$0xff]  ;;  %v18_v2 = vld [vmem:[%s224_s1 + $0x10] sm:$0xff]  ;;  %135 = vmatprep.subr.bf16.mxu0 %v169_v3  ;;  %132 = vmatprep.mubr.msk.f32.mxu0 %vm170_vm0, %v171_v6 }
   0x2   :  { %v136_v4 = vpack.c.bf16 %v17_v1, %v16_v0  ;;  %v19_v5 = vld [vmem:[%s224_s1 + $0x18] sm:$0xff] }
   0x3   :  { %8 = vsyncpa [#allocation3], 0  ;;  %v139_v7 = vpack.c.bf16 %v19_v5, %v18_v2  ;;  %v15_v8 = vld [vmem:[%s223_s0] sm:$0xff]  ;;  %vm27_vm1 = vcmask 261120   ;;  %s172_s24 = smov [#allocation2]   ;;  %vm101_vm2 = vcmask 64512  }
   0x4   :  { %137 = vmatpush3.bf16.msra.mxu0 %v136_v4  ;;  %v117_v9 = vld [vmem:[%s225_s2] ss:$0 sm:$0xff]  ;;  %s109_s1 = sshll.u32 %s172_s24, 4  ;;  %s110_s1 = int_to_ptr.vmem [resolvable:$true] %s109_s1 }
   0x5   :  { %138 = vmatprep.subr.bf16.mxu0 %v169_v3  ;;  %s145_s25 = scalar_lea.vmem %s110_s1, 128  ;;  %p150_p1 = scmp.lt.s32.totalorder %s110_s1, %s110_s1 }
   0x6   :  { %p146_p0 = scmp.ne.s32.totalorder %s110_s1, %s145_s25  ;;  %p151_p2 = scmp.lt.s32.totalorder %s145_s25, %s145_s25 }
   0x8   :  { %140 = vmatpush3.bf16.msra.mxu0 %v139_v7  ;;  %p152_p3 = por %p151_p2, %p150_p1 }
   0xa   :  { %p153_p4 = pnand %p152_p3, %p146_p0 }
   0xb   :  { %133 = vmatmul.mubr.msk.f32.vlgmr.msra.gmra.mrb[0].mxu0 %vm27_vm1, %v15_v8 }
  0xde   :  { %v97_v10 = vpop.f32.mrb[0].mxu0 }
  0xdf   :  { %v98_v11 = vadd.f32 %v117_v9, %v97_v10  ;;  %v134_v12 = vpop.f32.mrb[1].mxu0 }
  0xe1   :  { %102 = vst.msk [vmem:[#allocation2] sm:$0xff] %vm101_vm2, %v98_v11 }
  0xe2   :  { %156 = shalt.err (!%p153_p4)
}
  0xe3   :  { %s157_s27 = scalar_lea.hbm %s226_s3, 128 }
  0xe4   :  { %p158_p5 = scmp.ne.s32.totalorder %s226_s3, %s157_s27  ;;  %p161_p6 = scmp.lt.u32.totalorder %s157_s27, %s226_s3 }
  0xe6   :  { %p163_p7 = pnand %p161_p6, %p158_p5 }
  0xe8   :  { %166 = shalt.err (!%p163_p7)
}
  0xe9   :  { %112 = dma.vmem_to_hbm [thread:$0]  %s110_s1, 128, %s226_s3, [#allocation3]  }
  0xea   :  { %167 = dma.done.wait [#allocation3], 128  }
  0xeb   :  { %168 = vsyncadd [#allocation3], 4294967168 }
  0xec   :  { %116 = vsyncpa [#allocation3], 1 }

</bundles_post_ra>
